<compile_context>
chip_gen: v6e
topology: v6e:2x2x1
jax: 0.10.0
libtpu: 0.0.40
codegen_flags: <defaults>
</compile_context>

<pallas_src>
import functools
from typing import NamedTuple

import jax
import jax.numpy as jnp
from jax.experimental import pallas as pl
from jax.experimental.pallas import tpu as pltpu


def _r8(v):
    return ((v + 7) // 8) * 8


def _r128(v):
    return ((v + 127) // 128) * 128


class PackMeta(NamedTuple):
    nb: int
    H: int
    L0: int
    L1: int
    L2: int
    P: int
    o1: int   # row offset of w1 inside the packed layers-1..3 buffer
    o2: int   # row offset of w2
    o3: int   # row offset of w3


# --------------------------------------------------------------------------
# One-time weight packing (host / trace time): compact, no block-diag zeros.
# --------------------------------------------------------------------------
def pack_params(params):
    """Pack stacked per-band weights into 3 contiguous, tile-aligned buffers.

    Buffers (all float32):
      w123  : (nb, R123, C123)  rows [o1,o1+H)=w1, [o2,o2+L0)=w2, [o3,o3+L1)=w3
      w4p   : (nb, R4,   C4)    rows [0,L2)=w4
      biases: (nb, 4,    Cb)    row i = bias of layer i+1 (lane-prefix valid)
    """
    w1, w2, w3, w4 = (params[k] for k in ("w1", "w2", "w3", "w4"))
    b1, b2, b3, b4 = (params[k] for k in ("b1", "b2", "b3", "b4"))

    nb, H, L0 = w1.shape
    L1 = w2.shape[2]
    L2 = w3.shape[2]
    P = w4.shape[2]

    o1 = 0
    o2 = o1 + _r8(H)
    o3 = o2 + _r8(L0)
    R123 = o3 + _r8(L1)
    C123 = _r128(max(L0, L1, L2))

    w123 = jnp.zeros((nb, R123, C123), jnp.float32)
    w123 = w123.at[:, o1:o1 + H, :L0].set(w1.astype(jnp.float32))
    w123 = w123.at[:, o2:o2 + L0, :L1].set(w2.astype(jnp.float32))
    w123 = w123.at[:, o3:o3 + L1, :L2].set(w3.astype(jnp.float32))

    R4, C4 = _r8(L2), _r128(P)
    w4p = jnp.zeros((nb, R4, C4), jnp.float32).at[:, :L2, :P].set(
        w4.astype(jnp.float32))

    Cb = _r128(max(L0, L1, L2, P))
    biases = jnp.zeros((nb, 4, Cb), jnp.float32)
    biases = biases.at[:, 0, :L0].set(b1.reshape(nb, L0).astype(jnp.float32))
    biases = biases.at[:, 1, :L1].set(b2.reshape(nb, L1).astype(jnp.float32))
    biases = biases.at[:, 2, :L2].set(b3.reshape(nb, L2).astype(jnp.float32))
    biases = biases.at[:, 3, :P].set(b4.reshape(nb, P).astype(jnp.float32))

    meta = PackMeta(nb=nb, H=H, L0=L0, L1=L1, L2=L2, P=P, o1=o1, o2=o2, o3=o3)
    return (w123, w4p, biases), meta


# --------------------------------------------------------------------------
# Kernel: whole multi-band forward, batched over bands, everything in VMEM.
# --------------------------------------------------------------------------
def _make_kernel(meta: PackMeta, B: int):
    nb, H, L0, L1, L2, P = meta.nb, meta.H, meta.L0, meta.L1, meta.L2, meta.P
    o1, o2, o3 = meta.o1, meta.o2, meta.o3

    def kernel(x_ref, w123_ref, w4_ref, b_ref, o_ref):
        x = x_ref[...]                                        # (B, H)
        xb = jnp.broadcast_to(x[None, :, :], (nb, B, H))      # (nb, B, H)

        # Static, tile-aligned slices of the packed buffers (free views).
        w1 = w123_ref[:, o1:o1 + H, :L0]                      # (nb, H,  L0)
        w2 = w123_ref[:, o2:o2 + L0, :L1]                     # (nb, L0, L1)
        w3 = w123_ref[:, o3:o3 + L1, :L2]                     # (nb, L1, L2)
        w4 = w4_ref[:, :L2, :P]                               # (nb, L2, P)
        b1 = b_ref[:, 0:1, :L0]                               # (nb, 1, L0)
        b2 = b_ref[:, 1:2, :L1]                               # (nb, 1, L1)
        b3 = b_ref[:, 2:3, :L2]                               # (nb, 1, L2)
        b4 = b_ref[:, 3:4, :P]                                # (nb, 1, P)

        h = jnp.einsum('nbh,nhl->nbl', xb, w1,
                       preferred_element_type=jnp.float32) + b1
        h = jnp.maximum(h, 0.0)                               # (nb, B, L0)

        h = jnp.einsum('nbk,nkl->nbl', h, w2,
                       preferred_element_type=jnp.float32) + b2
        h = jnp.maximum(h, 0.0)                               # (nb, B, L1)

        h = jnp.einsum('nbk,nkl->nbl', h, w3,
                       preferred_element_type=jnp.float32) + b3
        h = jnp.maximum(h, 0.0)                               # (nb, B, L2)

        out = jnp.einsum('nbk,nkp->nbp', h, w4,
                         preferred_element_type=jnp.float32) + b4
        o_ref[...] = out.astype(o_ref.dtype)                  # (nb, B, P)

    return kernel


# --------------------------------------------------------------------------
# Wrapper: single pallas_call, no grid, all operands VMEM-resident.
# --------------------------------------------------------------------------
@functools.partial(jax.jit, static_argnames=("meta",))
def pred_bandstructures(x, packed, meta: PackMeta):
    """x: (B, H) float32. packed/meta: output of pack_params.
    Returns (B, num_predict, nbands), matching PyTorch Pred forward."""
    w123, w4p, biases = packed
    B = x.shape[0]
    nb, P = meta.nb, meta.P

    vmem = pl.BlockSpec(memory_space=pltpu.MemorySpace.VMEM)
    out_nbp = pl.pallas_call(
        _make_kernel(meta, B),
        out_shape=jax.ShapeDtypeStruct((nb, B, P), x.dtype),
        in_specs=[vmem, vmem, vmem, vmem],
        out_specs=vmem,
    )(x, w123, w4p, biases)

    # Lane-dense kernel output (nb, B, P) -> PyTorch layout (B, P, nb).
    # This tiny transpose is the only post-kernel op (see header, item 3).
    return jnp.transpose(out_nbp, (1, 2, 0))


# --------------------------------------------------------------------------
# Synthetic params + plain-JAX reference for correctness checking.
# --------------------------------------------------------------------------
def init_params(key, nbands, hidden, Lvp, num_predict):
    """Deterministic synthetic init of per-band MLP weights (stacked on band axis)."""
    dims = [hidden, Lvp[0], Lvp[1], Lvp[2], num_predict]
    params = {}
    for layer in range(4):
        fan_in, fan_out = dims[layer], dims[layer + 1]
        key, kw, kb = jax.random.split(key, 3)
        scale = 1.0 / jnp.sqrt(jnp.float32(fan_in))
        params[f"w{layer + 1}"] = jax.random.uniform(
            kw, (nbands, fan_in, fan_out), jnp.float32, -scale, scale)
        params[f"b{layer + 1}"] = jax.random.uniform(
            kb, (nbands, 1, fan_out), jnp.float32, -scale, scale)
    return params


def _reference(x, params):
    """Plain-JAX reference of the per-band forward (mirrors the PyTorch module)."""
    outs = []
    nbands = params["w1"].shape[0]
    for b in range(nbands):
        h = jnp.maximum(x @ params["w1"][b] + params["b1"][b], 0.0)
        h = jnp.maximum(h @ params["w2"][b] + params["b2"][b], 0.0)
        h = jnp.maximum(h @ params["w3"][b] + params["b3"][b], 0.0)
        outs.append(h @ params["w4"][b] + params["b4"][b])    # (B, P)
    return jnp.stack(outs, axis=2)                            # (B, P, nb)


if __name__ == "__main__":
    # Small shapes consistent with Pred(predict='bandstructures'):
    #   latent_dim (hidden) = 32, Lvp = [64, 64, 32], nbands = 6, num_predict = 128
    B, hidden = 8, 32
    Lvp = [64, 64, 32]
    nbands = 6
    num_predict = 128

    key = jax.random.PRNGKey(0)
    key, kx = jax.random.split(key)
    x = jax.random.normal(kx, (B, hidden), dtype=jnp.float32)
    params = init_params(key, nbands, hidden, Lvp, num_predict)

    packed, meta = pack_params(params)          # one-time compact repack
    out = pred_bandstructures(x, packed, meta=meta)
    out = jax.block_until_ready(out)

    ref = _reference(x, params)
    assert out.shape == (B, num_predict, nbands), out.shape
    assert jnp.allclose(out, ref, atol=1e-4, rtol=1e-4), "mismatch vs reference"

    print("KERNEL_OK")
</pallas_src>

<mosaic_0001>
module attributes {stable_mosaic.version = 11 : i64} {
  func.func @kernel(%arg0: memref<8x32xf32, #tpu.memory_space<vmem>>, %arg1: memref<6x160x128xf32, #tpu.memory_space<vmem>>, %arg2: memref<6x32x128xf32, #tpu.memory_space<vmem>>, %arg3: memref<6x4x128xf32, #tpu.memory_space<vmem>>, %arg4: memref<6x8x128xf32, #tpu.memory_space<vmem>>) attributes {dimension_semantics = [], scalar_prefetch = 0 : i64, scratch_operands = 0 : i64, tpu.core_type = #tpu.core_type<tc>} {
    %c0 = arith.constant 0 : index
    %c0_0 = arith.constant 0 : index
    %0 = vector.load %arg0[%c0, %c0_0] : memref<8x32xf32, #tpu.memory_space<vmem>>, vector<8x32xf32>
    %1 = vector.shape_cast %0 : vector<8x32xf32> to vector<1x8x32xf32>
    %2 = vector.shape_cast %1 : vector<1x8x32xf32> to vector<1x8x32xf32>
    %3 = vector.broadcast %2 : vector<1x8x32xf32> to vector<6x8x32xf32>
    %c0_1 = arith.constant 0 : index
    %c0_2 = arith.constant 0 : index
    %c0_3 = arith.constant 0 : index
    %4 = vector.load %arg1[%c0_1, %c0_2, %c0_3] : memref<6x160x128xf32, #tpu.memory_space<vmem>>, vector<6x32x64xf32>
    %c0_4 = arith.constant 0 : index
    %c32 = arith.constant 32 : index
    %c0_5 = arith.constant 0 : index
    %5 = vector.load %arg1[%c0_4, %c32, %c0_5] : memref<6x160x128xf32, #tpu.memory_space<vmem>>, vector<6x64x64xf32>
    %c0_6 = arith.constant 0 : index
    %c96 = arith.constant 96 : index
    %c0_7 = arith.constant 0 : index
    %6 = vector.load %arg1[%c0_6, %c96, %c0_7] : memref<6x160x128xf32, #tpu.memory_space<vmem>>, vector<6x64x32xf32>
    %c0_8 = arith.constant 0 : index
    %c0_9 = arith.constant 0 : index
    %c0_10 = arith.constant 0 : index
    %7 = vector.load %arg2[%c0_8, %c0_9, %c0_10] : memref<6x32x128xf32, #tpu.memory_space<vmem>>, vector<6x32x128xf32>
    %c0_11 = arith.constant 0 : index
    %c0_12 = arith.constant 0 : index
    %c0_13 = arith.constant 0 : index
    %8 = vector.load %arg3[%c0_11, %c0_12, %c0_13] : memref<6x4x128xf32, #tpu.memory_space<vmem>>, vector<6x1x64xf32>
    %c0_14 = arith.constant 0 : index
    %c1 = arith.constant 1 : index
    %c0_15 = arith.constant 0 : index
    %9 = vector.load %arg3[%c0_14, %c1, %c0_15] : memref<6x4x128xf32, #tpu.memory_space<vmem>>, vector<6x1x64xf32>
    %c0_16 = arith.constant 0 : index
    %c2 = arith.constant 2 : index
    %c0_17 = arith.constant 0 : index
    %10 = vector.load %arg3[%c0_16, %c2, %c0_17] : memref<6x4x128xf32, #tpu.memory_space<vmem>>, vector<6x1x32xf32>
    %c0_18 = arith.constant 0 : index
    %c3 = arith.constant 3 : index
    %c0_19 = arith.constant 0 : index
    %11 = vector.load %arg3[%c0_18, %c3, %c0_19] : memref<6x4x128xf32, #tpu.memory_space<vmem>>, vector<6x1x128xf32>
    "tpu.trace_start"() <{level = 10 : i32, message = "nbh,nhl->nbl"}> : () -> ()
    %cst = arith.constant dense<0.000000e+00> : vector<6x8x64xf32>
    %12 = tpu.matmul %3, %4, %cst {dimension_numbers = #tpu.dot_dimension_numbers<[2], [1], [1], [2], [0, 0, 0, 1, 1, 2], [0], [0]>} : vector<6x8x32xf32>, vector<6x32x64xf32>, vector<6x8x64xf32> -> vector<6x8x64xf32>
    "tpu.trace_stop"() : () -> ()
    %13 = vector.broadcast %8 : vector<6x1x64xf32> to vector<6x8x64xf32>
    %14 = arith.addf %12, %13 : vector<6x8x64xf32>
    %cst_20 = arith.constant 0.000000e+00 : f32
    %15 = vector.broadcast %cst_20 : f32 to vector<6x8x64xf32>
    %16 = arith.maximumf %14, %15 : vector<6x8x64xf32>
    "tpu.trace_start"() <{level = 10 : i32, message = "nbk,nkl->nbl"}> : () -> ()
    %cst_21 = arith.constant dense<0.000000e+00> : vector<6x8x64xf32>
    %17 = tpu.matmul %16, %5, %cst_21 {dimension_numbers = #tpu.dot_dimension_numbers<[2], [1], [1], [2], [0, 0, 0, 1, 1, 2], [0], [0]>} : vector<6x8x64xf32>, vector<6x64x64xf32>, vector<6x8x64xf32> -> vector<6x8x64xf32>
    "tpu.trace_stop"() : () -> ()
    %18 = vector.broadcast %9 : vector<6x1x64xf32> to vector<6x8x64xf32>
    %19 = arith.addf %17, %18 : vector<6x8x64xf32>
    %cst_22 = arith.constant 0.000000e+00 : f32
    %20 = vector.broadcast %cst_22 : f32 to vector<6x8x64xf32>
    %21 = arith.maximumf %19, %20 : vector<6x8x64xf32>
    "tpu.trace_start"() <{level = 10 : i32, message = "nbk,nkl->nbl"}> : () -> ()
    %cst_23 = arith.constant dense<0.000000e+00> : vector<6x8x32xf32>
    %22 = tpu.matmul %21, %6, %cst_23 {dimension_numbers = #tpu.dot_dimension_numbers<[2], [1], [1], [2], [0, 0, 0, 1, 1, 2], [0], [0]>} : vector<6x8x64xf32>, vector<6x64x32xf32>, vector<6x8x32xf32> -> vector<6x8x32xf32>
    "tpu.trace_stop"() : () -> ()
    %23 = vector.broadcast %10 : vector<6x1x32xf32> to vector<6x8x32xf32>
    %24 = arith.addf %22, %23 : vector<6x8x32xf32>
    %cst_24 = arith.constant 0.000000e+00 : f32
    %25 = vector.broadcast %cst_24 : f32 to vector<6x8x32xf32>
    %26 = arith.maximumf %24, %25 : vector<6x8x32xf32>
    "tpu.trace_start"() <{level = 10 : i32, message = "nbk,nkp->nbp"}> : () -> ()
    %cst_25 = arith.constant dense<0.000000e+00> : vector<6x8x128xf32>
    %27 = tpu.matmul %26, %7, %cst_25 {dimension_numbers = #tpu.dot_dimension_numbers<[2], [1], [1], [2], [0, 0, 0, 1, 1, 2], [0], [0]>} : vector<6x8x32xf32>, vector<6x32x128xf32>, vector<6x8x128xf32> -> vector<6x8x128xf32>
    "tpu.trace_stop"() : () -> ()
    %28 = vector.broadcast %11 : vector<6x1x128xf32> to vector<6x8x128xf32>
    %29 = arith.addf %27, %28 : vector<6x8x128xf32>
    %c0_26 = arith.constant 0 : index
    %c0_27 = arith.constant 0 : index
    %c0_28 = arith.constant 0 : index
    %30 = vector.load %arg4[%c0_26, %c0_27, %c0_28] : memref<6x8x128xf32, #tpu.memory_space<vmem>>, vector<6x8x128xf32>
    tpu.vector_store %arg4[%c0_26, %c0_27, %c0_28], %29 {strides = array<i32>} : memref<6x8x128xf32, #tpu.memory_space<vmem>>, vector<6x8x128xf32>,
    return
  }
}

</mosaic_0001>

<bundles_post_ra>
// kernel: pred_bandstructures.1
= control target key start
LH: loop header
LB: loop body
LE: loop exit
PB: predicated region body
PF: predicated region fallthrough
CT: control target
= control target key end

     0   :  { %9 = vsyncpa [#allocation3], 0  ;;  %s3097_s0 = inlined_call_operand.hbm [shape: f32[8,32], index: 0, kind: input, shape index: {}]   ;;  %s3098_s1 = inlined_call_operand.hbm [shape: f32[6,160,128], index: 1, kind: input, shape index: {}]   ;;  %s3099_s2 = inlined_call_operand.hbm [shape: f32[6,32,128], index: 2, kind: input, shape index: {}]   ;;  %s3100_s3 = inlined_call_operand.hbm [shape: f32[6,4,128], index: 3, kind: input, shape index: {}]   ;;  %s3101_s4 = inlined_call_operand.hbm [shape: f32[6,8,128], index: 4, kind: output, shape index: {}]  }
   0x1   :  { %10 = vsyncpa [#allocation6], 0 }
   0x2   :  { %11 = vsyncpa [#allocation9], 0 }
   0x3   :  { %12 = vsyncpa [#allocation4], 0  ;;  %s2813_s15 = smov [#allocation5]  }
   0x4   :  { %s28_s16 = sshll.u32 %s2813_s15, 4  ;;  %s29_s16 = int_to_ptr.vmem [resolvable:$true] %s28_s16 }
   0x5   :  { %s2713_s17 = scalar_lea.vmem %s29_s16, 15360  ;;  %p2718_p1 = scmp.lt.s32.totalorder %s29_s16, %s29_s16 }
   0x6   :  { %p2714_p0 = scmp.ne.s32.totalorder %s29_s16, %s2713_s17  ;;  %p2719_p2 = scmp.lt.s32.totalorder %s2713_s17, %s2713_s17 }
   0x8   :  { %p2720_p3 = por %p2719_p2, %p2718_p1 }
   0xa   :  { %p2721_p4 = pnand %p2720_p3, %p2714_p0 }
   0xc   :  { %2724 = shalt.err (!%p2721_p4)
}
   0xd   :  { %s2814_s18 = smov 128   ;;  %s2815_s19 = smov 8  }
   0xe   :  { %34 = dma.hbm_to_vmem [thread:$0]  %s3098_s1, 15360, %s29_s16, [#allocation6], %s2814_s18, %s2814_s18, %s2815_s19  }
   0xf   :  { %s2816_s22 = smov [#allocation2]   ;;  %s2817_s24 = smov [#allocation7]  }
  0x10   :  { %s19_s23 = sshll.u32 %s2816_s22, 4  ;;  %s40_s25 = sshll.u32 %s2817_s24, 4  ;;  %s20_s23 = int_to_ptr.vmem [resolvable:$true] %s19_s23  ;;  %s41_s25 = int_to_ptr.vmem [resolvable:$true] %s40_s25 }
  0x11   :  { %s2733_s26 = scalar_lea.vmem %s20_s23, 128  ;;  %p2738_p6 = scmp.lt.s32.totalorder %s20_s23, %s20_s23 }
  0x12   :  { %p2734_p5 = scmp.ne.s32.totalorder %s20_s23, %s2733_s26  ;;  %p2739_p7 = scmp.lt.s32.totalorder %s2733_s26, %s2733_s26 }
  0x14   :  { %p2740_p8 = por %p2739_p7, %p2738_p6 }
  0x16   :  { %p2741_p9 = pnand %p2740_p8, %p2734_p5 }
  0x18   :  { %2744 = shalt.err (!%p2741_p9)
}
  0x19   :  { %22 = dma.hbm_to_vmem [thread:$0]  %s3097_s0, 128, %s20_s23, [#allocation3]  }
  0x1a   :  { %s2753_s29 = scalar_lea.vmem %s41_s25, 3072  ;;  %p2758_p11 = scmp.lt.s32.totalorder %s41_s25, %s41_s25 }
  0x1b   :  { %p2754_p10 = scmp.ne.s32.totalorder %s41_s25, %s2753_s29  ;;  %p2759_p12 = scmp.lt.s32.totalorder %s2753_s29, %s2753_s29 }
  0x1d   :  { %p2760_p13 = por %p2759_p12, %p2758_p11 }
  0x1f   :  { %p2761_p0 = pnand %p2760_p13, %p2754_p10 }
  0x21   :  { %2764 = shalt.err (!%p2761_p0)
}
  0x22   :  { %46 = dma.hbm_to_vmem [thread:$0]  %s3099_s2, 3072, %s41_s25, [#allocation6], %s2814_s18, %s2814_s18, %s2815_s19  }
  0x23   :  { %s2818_s5 = smov [#allocation8]  }
  0x24   :  { %s52_s6 = sshll.u32 %s2818_s5, 4  ;;  %s53_s6 = int_to_ptr.vmem [resolvable:$true] %s52_s6 }
  0x25   :  { %s2773_s7 = scalar_lea.vmem %s53_s6, 384  ;;  %p2778_p2 = scmp.lt.s32.totalorder %s53_s6, %s53_s6 }
  0x26   :  { %p2774_p1 = scmp.ne.s32.totalorder %s53_s6, %s2773_s7  ;;  %p2779_p3 = scmp.lt.s32.totalorder %s2773_s7, %s2773_s7 }
  0x28   :  { %p2780_p4 = por %p2779_p3, %p2778_p2 }
  0x2a   :  { %p2781_p5 = pnand %p2780_p4, %p2774_p1 }
  0x2c   :  { %2784 = shalt.err (!%p2781_p5)
}
  0x2d   :  { %s2819_s0 = smov 64   ;;  %s2820_s8 = smov 4  }
  0x2e   :  { %58 = dma.hbm_to_vmem [thread:$0]  %s3100_s3, 384, %s53_s6, [#allocation9], %s2819_s0, %s2819_s0, %s2820_s8  }
  0x2f   :  { %2805 = dma.done.wait [#allocation3], 128  }
  0x30   :  { %2806 = vsyncadd [#allocation3], 4294967168 }
  0x31   :  { %2807 = dma.done.wait [#allocation6], 18432  }
  0x32   :  { %2808 = vsyncadd [#allocation6], 4294948864 }
  0x33   :  { %2809 = dma.done.wait [#allocation9], 384  }
  0x34   :  { %2810 = vsyncadd [#allocation9], 4294966912  ;;  %v2821_v0 = vmov 0.0   ;;  %vm2822_vm0 = vmmov 0   ;;  %v75_v1 = vld [vmem:[#allocation5 + $0x18] sm:$0xff]  ;;  %v74_v3 = vld [vmem:[#allocation5 + $0x10] sm:$0xff] }
  0x35   :  { %2334 = vmatprep.subr.mxu0 %v2821_v0  ;;  %2345 = vmatprep.subr.mxu1 %v2821_v0  ;;  %v79_v2 = vld [vmem:[#allocation5 + $0xb8] sm:$0xff]  ;;  %v78_v4 = vld [vmem:[#allocation5 + $0xb0] sm:$0xff]  ;;  %v73_v5 = vld [vmem:[#allocation5 + $0x8] sm:$0xff]  ;;  %vm264_vm1 = vcmask 261120   ;;  %vm718_vm2 = vcmask 523264   ;;  %s2823_s2 = smov [#allocation10]  }
  0x36   :  { %2342 = vmatprep.mubr.msk.f32.mxu0 %vm2822_vm0, %v2821_v0  ;;  %2353 = vmatprep.mubr.msk.f32.mxu1 %vm2822_vm0, %v2821_v0  ;;  %v77_v6 = vld [vmem:[#allocation5 + $0xa8] sm:$0xff]  ;;  %v72_v7 = vld [vmem:[#allocation5] sm:$0xff]  ;;  %v2877_v9 = vld [vmem:[#allocation2] sm:$0xff]  ;;  %s2104_s3 = sshll.u32 %s2823_s2, 4  ;;  %s2105_s3 = int_to_ptr.vmem [resolvable:$true] %s2104_s3 }
  0x37   :  { %2335 = vmatpush3.msra.mxu0 %v75_v1  ;;  %2346 = vmatpush3.msra.mxu1 %v79_v2  ;;  %v76_v8 = vld [vmem:[#allocation5 + $0xa0] sm:$0xff]  ;;  %v83_v10 = vld [vmem:[#allocation5 + $0x158] sm:$0xff]  ;;  %v82_v12 = vld [vmem:[#allocation5 + $0x150] sm:$0xff]  ;;  %s2785_s11 = scalar_lea.vmem %s2105_s3, 768  ;;  %p2790_p7 = scmp.lt.s32.totalorder %s2105_s3, %s2105_s3 }
  0x38   :  { %2336 = vmatprep.subr.mxu0 %v2821_v0  ;;  %2347 = vmatprep.subr.mxu1 %v2821_v0  ;;  %v87_v11 = vld [vmem:[#allocation5 + $0x1f8] sm:$0xff]  ;;  %v86_v13 = vld [vmem:[#allocation5 + $0x1f0] sm:$0xff]  ;;  %v81_v14 = vld [vmem:[#allocation5 + $0x148] sm:$0xff]  ;;  %p2786_p6 = scmp.ne.s32.totalorder %s2105_s3, %s2785_s11  ;;  %p2791_p8 = scmp.lt.s32.totalorder %s2785_s11, %s2785_s11 }
  0x39   :  { %2337 = vmatpush3.msra.mxu0 %v74_v3  ;;  %2348 = vmatpush3.msra.mxu1 %v78_v4  ;;  %v85_v15 = vld [vmem:[#allocation5 + $0x1e8] sm:$0xff]  ;;  %v80_v16 = vld [vmem:[#allocation5 + $0x140] sm:$0xff]  ;;  %v91_v18 = vld [vmem:[#allocation5 + $0x298] sm:$0xff] }
  0x3a   :  { %2338 = vmatprep.subr.mxu0 %v2821_v0  ;;  %2349 = vmatprep.subr.mxu1 %v2821_v0  ;;  %v84_v17 = vld [vmem:[#allocation5 + $0x1e0] sm:$0xff]  ;;  %v95_v19 = vld [vmem:[#allocation5 + $0x338] sm:$0xff]  ;;  %v90_v20 = vld [vmem:[#allocation5 + $0x290] sm:$0xff]  ;;  %p2792_p9 = por %p2791_p8, %p2790_p7 }
  0x3b   :  { %2339 = vmatpush3.msra.mxu0 %v73_v5  ;;  %2350 = vmatpush3.msra.mxu1 %v77_v6  ;;  %v94_v21 = vld [vmem:[#allocation5 + $0x330] sm:$0xff]  ;;  %v89_v22 = vld [vmem:[#allocation5 + $0x288] sm:$0xff]  ;;  %v88_v24 = vld [vmem:[#allocation5 + $0x280] sm:$0xff] }
  0x3c   :  { %2340 = vmatprep.subr.mxu0 %v2821_v0  ;;  %2351 = vmatprep.subr.mxu1 %v2821_v0  ;;  %v93_v23 = vld [vmem:[#allocation5 + $0x328] sm:$0xff]  ;;  %v92_v25 = vld [vmem:[#allocation5 + $0x320] sm:$0xff]  ;;  %v103_v26 = vld [vmem:[#allocation5 + $0x58] sm:$0xff]  ;;  %p2793_p10 = pnand %p2792_p9, %p2786_p6 }
  0x3d   :  { %2341 = vmatpush3.msra.mxu0 %v72_v7  ;;  %2352 = vmatpush3.msra.mxu1 %v76_v8  ;;  %v111_v27 = vld [vmem:[#allocation5 + $0xf8] sm:$0xff]  ;;  %v102_v28 = vld [vmem:[#allocation5 + $0x50] sm:$0xff]  ;;  %v101_v30 = vld [vmem:[#allocation5 + $0x48] sm:$0xff] }
  0x3e   :  { %2343 = vmatmul.mubr.msk.f32.vlgmr.msra.gmra.mxu0 %vm264_vm1, %v2877_v9  ;;  %2354 = vmatmul.mubr.msk.f32.vlgmr.msra.gmra.mxu1 %vm264_vm1, %v2877_v9  ;;  %v110_v29 = vld [vmem:[#allocation5 + $0xf0] sm:$0xff]  ;;  %v109_v31 = vld [vmem:[#allocation5 + $0xe8] sm:$0xff]  ;;  %v100_v32 = vld [vmem:[#allocation5 + $0x40] sm:$0xff] }
  0x3f   :  { %2356 = vmatprep.subr.mxu0 %v2821_v0  ;;  %2367 = vmatprep.subr.mxu1 %v2821_v0  ;;  %v108_v33 = vld [vmem:[#allocation5 + $0xe0] sm:$0xff]  ;;  %v99_v34 = vld [vmem:[#allocation5 + $0x38] sm:$0xff]  ;;  %v98_v36 = vld [vmem:[#allocation5 + $0x30] sm:$0xff] }
  0x40   :  { %2357 = vmatpush3.msra.mxu0 %v83_v10  ;;  %2368 = vmatpush3.msra.mxu1 %v87_v11  ;;  %v107_v35 = vld [vmem:[#allocation5 + $0xd8] sm:$0xff]  ;;  %v106_v37 = vld [vmem:[#allocation5 + $0xd0] sm:$0xff]  ;;  %v97_v38 = vld [vmem:[#allocation5 + $0x28] sm:$0xff] }
  0x41   :  { %2358 = vmatprep.subr.mxu0 %v2821_v0  ;;  %2369 = vmatprep.subr.mxu1 %v2821_v0  ;;  %v105_v39 = vld [vmem:[#allocation5 + $0xc8] sm:$0xff]  ;;  %v96_v40 = vld [vmem:[#allocation5 + $0x20] sm:$0xff]  ;;  %v119_v52 = vld [vmem:[#allocation5 + $0x198] sm:$0xff] }
  0x42   :  { %2359 = vmatpush3.msra.mxu0 %v82_v12  ;;  %2370 = vmatpush3.msra.mxu1 %v86_v13  ;;  %v104_v41 = vld [vmem:[#allocation5 + $0xc0] sm:$0xff]  ;;  %v127_v53 = vld [vmem:[#allocation5 + $0x238] sm:$0xff]  ;;  %v118_v54 = vld [vmem:[#allocation5 + $0x190] sm:$0xff] }
  0x43   :  { %2360 = vmatprep.subr.mxu0 %v2821_v0  ;;  %2371 = vmatprep.subr.mxu1 %v2821_v0  ;;  %v2118_v42 = vld [vmem:[#allocation8] ss:$0 sm:$0xff]  ;;  %v2119_v43 = vld [vmem:[#allocation8 + $0x4] ss:$0 sm:$0xff]  ;;  %v126_v55 = vld [vmem:[#allocation5 + $0x230] sm:$0xff] }
  0x44   :  { %2361 = vmatpush3.msra.mxu0 %v81_v14  ;;  %2372 = vmatpush3.msra.mxu1 %v85_v15  ;;  %v117_v56 = vld [vmem:[#allocation5 + $0x188] sm:$0xff]  ;;  %v116_v58 = vld [vmem:[#allocation5 + $0x180] sm:$0xff]  ;;  %v115_v60 = vld [vmem:[#allocation5 + $0x178] sm:$0xff] }
  0x45   :  { %2362 = vmatprep.subr.mxu0 %v2821_v0  ;;  %2373 = vmatprep.subr.mxu1 %v2821_v0  ;;  %v125_v57 = vld [vmem:[#allocation5 + $0x228] sm:$0xff]  ;;  %v124_v59 = vld [vmem:[#allocation5 + $0x220] sm:$0xff]  ;;  %v123_v63 = vld [vmem:[#allocation5 + $0x218] sm:$0xff] }
  0x46   :  { %2363 = vmatpush3.msra.mxu0 %v80_v16  ;;  %2364 = vmatprep.mubr.msk.f32.mxu0 %vm2822_vm0, %v2821_v0  ;;  %v2120_v1 = vld [vmem:[#allocation8 + $0x8] ss:$0 sm:$0xff]  ;;  %v2121_v2 = vld [vmem:[#allocation8 + $0xc] ss:$0 sm:$0xff]  ;;  %v114_v5 = vld [vmem:[#allocation5 + $0x170] sm:$0xff] }
  0x47   :  { %2374 = vmatpush3.msra.mxu1 %v84_v17  ;;  %2375 = vmatprep.mubr.msk.f32.mxu1 %vm2822_vm0, %v2821_v0  ;;  %v122_v6 = vld [vmem:[#allocation5 + $0x210] sm:$0xff]  ;;  %v121_v10 = vld [vmem:[#allocation5 + $0x208] sm:$0xff]  ;;  %v112_v11 = vld [vmem:[#allocation5 + $0x160] sm:$0xff] }
  0x48   :  { %2365 = vmatmul.mubr.msk.f32.vlgmr.msra.gmra.mxu0 %vm264_vm1, %v2877_v9  ;;  %2376 = vmatmul.mubr.msk.f32.vlgmr.msra.gmra.mxu1 %vm264_vm1, %v2877_v9  ;;  %v120_v14 = vld [vmem:[#allocation5 + $0x200] sm:$0xff]  ;;  %v135_v17 = vld [vmem:[#allocation5 + $0x2d8] sm:$0xff] }
  0x49   :  { %2378 = vmatprep.subr.mxu0 %v2821_v0  ;;  %2389 = vmatprep.subr.mxu1 %v2821_v0 }
  0x4a   :  { %2379 = vmatpush3.msra.mxu0 %v91_v18  ;;  %2390 = vmatpush3.msra.mxu1 %v95_v19  ;;  %v143_v18 = vld [vmem:[#allocation5 + $0x378] sm:$0xff] }
  0x4b   :  { %2380 = vmatprep.subr.mxu0 %v2821_v0  ;;  %2391 = vmatprep.subr.mxu1 %v2821_v0 }
  0x4c   :  { %2381 = vmatpush3.msra.mxu0 %v90_v20  ;;  %2392 = vmatpush3.msra.mxu1 %v94_v21  ;;  %v134_v21 = vld [vmem:[#allocation5 + $0x2d0] sm:$0xff] }
  0x4d   :  { %2382 = vmatprep.subr.mxu0 %v2821_v0  ;;  %2393 = vmatprep.subr.mxu1 %v2821_v0 }
  0x4e   :  { %2383 = vmatpush3.msra.mxu0 %v89_v22  ;;  %2394 = vmatpush3.msra.mxu1 %v93_v23  ;;  %v142_v22 = vld [vmem:[#allocation5 + $0x370] sm:$0xff]  ;;  %v133_v23 = vld [vmem:[#allocation5 + $0x2c8] sm:$0xff] }
  0x4f   :  { %2384 = vmatprep.subr.mxu0 %v2821_v0  ;;  %2395 = vmatprep.subr.mxu1 %v2821_v0 }
  0x50   :  { %2385 = vmatpush3.msra.mxu0 %v88_v24  ;;  %2386 = vmatprep.mubr.msk.f32.mxu0 %vm2822_vm0, %v2821_v0  ;;  %v141_v24 = vld [vmem:[#allocation5 + $0x368] sm:$0xff] }
  0x51   :  { %2396 = vmatpush3.msra.mxu1 %v92_v25  ;;  %2397 = vmatprep.mubr.msk.f32.mxu1 %vm2822_vm0, %v2821_v0  ;;  %v132_v25 = vld [vmem:[#allocation5 + $0x2c0] sm:$0xff] }
  0x52   :  { %2387 = vmatmul.mubr.msk.f32.vlgmr.msra.gmra.mxu0 %vm264_vm1, %v2877_v9  ;;  %2398 = vmatmul.mubr.msk.f32.vlgmr.msra.gmra.mxu1 %vm264_vm1, %v2877_v9  ;;  %v113_v9 = vld [vmem:[#allocation5 + $0x168] sm:$0xff] }
  0x53   :  { %2400 = vmatprep.subr.mxu0 %v2821_v0  ;;  %2419 = vmatprep.subr.mxu1 %v2821_v0 }
  0x54   :  { %2401 = vmatpush3.msra.mxu0 %v103_v26  ;;  %2420 = vmatpush3.msra.mxu1 %v111_v27  ;;  %v140_v26 = vld [vmem:[#allocation5 + $0x360] sm:$0xff]  ;;  %v2122_v27 = vld [vmem:[#allocation8 + $0x10] ss:$0 sm:$0xff] }
  0x55   :  { %2402 = vmatprep.subr.mxu0 %v2821_v0  ;;  %2421 = vmatprep.subr.mxu1 %v2821_v0 }
  0x56   :  { %2403 = vmatpush3.msra.mxu0 %v102_v28  ;;  %2422 = vmatpush3.msra.mxu1 %v110_v29  ;;  %v2123_v28 = vld [vmem:[#allocation8 + $0x14] ss:$0 sm:$0xff]  ;;  %v131_v29 = vld [vmem:[#allocation5 + $0x2b8] sm:$0xff] }
  0x57   :  { %2404 = vmatprep.subr.mxu0 %v2821_v0  ;;  %2423 = vmatprep.subr.mxu1 %v2821_v0 }
  0x58   :  { %2405 = vmatpush3.msra.mxu0 %v101_v30  ;;  %2424 = vmatpush3.msra.mxu1 %v109_v31  ;;  %v139_v30 = vld [vmem:[#allocation5 + $0x358] sm:$0xff]  ;;  %v130_v31 = vld [vmem:[#allocation5 + $0x2b0] sm:$0xff] }
  0x59   :  { %2406 = vmatprep.subr.mxu0 %v2821_v0  ;;  %2425 = vmatprep.subr.mxu1 %v2821_v0 }
  0x5a   :  { %2407 = vmatpush3.msra.mxu0 %v100_v32  ;;  %2426 = vmatpush3.msra.mxu1 %v108_v33  ;;  %v138_v32 = vld [vmem:[#allocation5 + $0x350] sm:$0xff] }
  0x5b   :  { %2408 = vmatprep.subr.mxu0 %v2821_v0  ;;  %2427 = vmatprep.subr.mxu1 %v2821_v0 }
  0x5c   :  { %2409 = vmatpush3.msra.mxu0 %v99_v34  ;;  %2428 = vmatpush3.msra.mxu1 %v107_v35  ;;  %v129_v35 = vld [vmem:[#allocation5 + $0x2a8] sm:$0xff] }
  0x5d   :  { %2410 = vmatprep.subr.mxu0 %v2821_v0  ;;  %2429 = vmatprep.subr.mxu1 %v2821_v0 }
  0x5e   :  { %2411 = vmatpush3.msra.mxu0 %v98_v36  ;;  %2430 = vmatpush3.msra.mxu1 %v106_v37  ;;  %v137_v36 = vld [vmem:[#allocation5 + $0x348] sm:$0xff]  ;;  %v128_v37 = vld [vmem:[#allocation5 + $0x2a0] sm:$0xff] }
  0x5f   :  { %2412 = vmatprep.subr.mxu0 %v2821_v0  ;;  %2431 = vmatprep.subr.mxu1 %v2821_v0 }
  0x60   :  { %2416 = vmatprep.mubr.msk.f32.mxu0 %vm2822_vm0, %v2821_v0  ;;  %2435 = vmatprep.mubr.msk.f32.mxu1 %vm2822_vm0, %v2821_v0 }
  0x61   :  { %2413 = vmatpush3.msra.mxu0 %v97_v38  ;;  %2432 = vmatpush3.msra.mxu1 %v105_v39 }
  0x62   :  { %2414 = vmatprep.subr.mxu0 %v2821_v0  ;;  %2433 = vmatprep.subr.mxu1 %v2821_v0 }
  0x63   :  { %2415 = vmatpush3.msra.mxu0 %v96_v40  ;;  %2434 = vmatpush3.msra.mxu1 %v104_v41  ;;  %v136_v40 = vld [vmem:[#allocation5 + $0x340] sm:$0xff]  ;;  %v151_v41 = vld [vmem:[#allocation5 + $0x98] sm:$0xff] }
  0x64   :  { %2438 = vmatprep.subr.mxu0 %v2821_v0  ;;  %2457 = vmatprep.subr.mxu1 %v2821_v0 }
  0xfe   :  { %v334_v44 = vpop.f32.mrf.mxu0  ;;  %v404_v45 = vpop.f32.mrf.mxu1 }
  0xff   :  { %v335_v46 = vadd.f32 %v2118_v42, %v334_v44  ;;  %v405_v47 = vadd.f32 %v2119_v43, %v404_v45  ;;  %v159_v42 = vld [vmem:[#allocation5 + $0x138] sm:$0xff]  ;;  %v150_v43 = vld [vmem:[#allocation5 + $0x90] sm:$0xff]  ;;  %v149_v45 = vld [vmem:[#allocation5 + $0x88] sm:$0xff] }
 0x100   :  { %v2344_v48 = vpop.f32.mrf.mxu0  ;;  %v2355_v49 = vpop.f32.mrf.mxu1  ;;  %v158_v44 = vld [vmem:[#allocation5 + $0x130] sm:$0xff] }
 0x101   :  { %v688_v50 = vmax.f32 %v335_v46, 0.0  ;;  %v689_v51 = vmax.f32 %v405_v47, 0.0  ;;  %v157_v46 = vld [vmem:[#allocation5 + $0x128] sm:$0xff]  ;;  %v148_v47 = vld [vmem:[#allocation5 + $0x80] sm:$0xff]  ;;  %v147_v49 = vld [vmem:[#allocation5 + $0x78] sm:$0xff] }
 0x102   :  { %v156_v48 = vld [vmem:[#allocation5 + $0x120] sm:$0xff] }
 0x103   :  { %2417 = vmatmul.mubr.msk.f32.vlgmr.msra.gmra.mxu0 %vm718_vm2, %v688_v50  ;;  %2436 = vmatmul.mubr.msk.f32.vlgmr.msra.gmra.mxu1 %vm718_vm2, %v689_v51  ;;  %v155_v50 = vld [vmem:[#allocation5 + $0x118] sm:$0xff]  ;;  %v146_v51 = vld [vmem:[#allocation5 + $0x70] sm:$0xff] }
 0x104   :  { %2439 = vmatpush3.msra.mxu0 %v119_v52  ;;  %2458 = vmatpush3.msra.mxu1 %v127_v53  ;;  %v154_v52 = vld [vmem:[#allocation5 + $0x110] sm:$0xff]  ;;  %v145_v53 = vld [vmem:[#allocation5 + $0x68] sm:$0xff] }
 0x105   :  { %2440 = vmatprep.subr.mxu0 %v2821_v0  ;;  %2459 = vmatprep.subr.mxu1 %v2821_v0 }
 0x106   :  { %2441 = vmatpush3.msra.mxu0 %v118_v54  ;;  %2460 = vmatpush3.msra.mxu1 %v126_v55  ;;  %v153_v54 = vld [vmem:[#allocation5 + $0x108] sm:$0xff]  ;;  %v144_v55 = vld [vmem:[#allocation5 + $0x60] sm:$0xff] }
 0x107   :  { %2442 = vmatprep.subr.mxu0 %v2821_v0  ;;  %2461 = vmatprep.subr.mxu1 %v2821_v0 }
 0x108   :  { %2443 = vmatpush3.msra.mxu0 %v117_v56  ;;  %2462 = vmatpush3.msra.mxu1 %v125_v57  ;;  %v474_v61 = vpop.f32.mrf.mxu0  ;;  %v544_v62 = vpop.f32.mrf.mxu1  ;;  %v152_v56 = vld [vmem:[#allocation5 + $0x100] sm:$0xff] }
 0x109   :  { %2444 = vmatprep.subr.mxu0 %v2821_v0  ;;  %2463 = vmatprep.subr.mxu1 %v2821_v0  ;;  %v475_v7 = vadd.f32 %v2120_v1, %v474_v61  ;;  %v545_v8 = vadd.f32 %v2121_v2, %v544_v62  ;;  %v2130_v57 = vld [vmem:[#allocation8 + $0x1] ss:$0 sm:$0xff] }
 0x10a   :  { %2445 = vmatpush3.msra.mxu0 %v116_v58  ;;  %2464 = vmatpush3.msra.mxu1 %v124_v59  ;;  %v2366_v3 = vpop.f32.mrf.mxu0  ;;  %v2377_v4 = vpop.f32.mrf.mxu1  ;;  %v2131_v58 = vld [vmem:[#allocation8 + $0x5] ss:$0 sm:$0xff] }
 0x10b   :  { %2446 = vmatprep.subr.mxu0 %v2821_v0  ;;  %2465 = vmatprep.subr.mxu1 %v2821_v0  ;;  %v690_v12 = vmax.f32 %v475_v7, 0.0  ;;  %v691_v13 = vmax.f32 %v545_v8, 0.0  ;;  %v167_v4 = vld [vmem:[#allocation5 + $0x1d8] sm:$0xff]  ;;  %v174_v7 = vld [vmem:[#allocation5 + $0x270] sm:$0xff]  ;;  %v165_v8 = vld [vmem:[#allocation5 + $0x1c8] sm:$0xff] }
 0x10c   :  { %2447 = vmatpush3.msra.mxu0 %v115_v60  ;;  %2466 = vmatpush3.msra.mxu1 %v123_v63 }
 0x10d   :  { %2448 = vmatprep.subr.mxu0 %v2821_v0  ;;  %2467 = vmatprep.subr.mxu1 %v2821_v0 }
 0x10e   :  { %2449 = vmatpush3.msra.mxu0 %v114_v5  ;;  %2468 = vmatpush3.msra.mxu1 %v122_v6  ;;  %v175_v5 = vld [vmem:[#allocation5 + $0x278] sm:$0xff]  ;;  %v166_v6 = vld [vmem:[#allocation5 + $0x1d0] sm:$0xff] }
 0x10f   :  { %2450 = vmatprep.subr.mxu0 %v2821_v0  ;;  %2469 = vmatprep.subr.mxu1 %v2821_v0 }
 0x110   :  { %2451 = vmatpush3.msra.mxu0 %v113_v9  ;;  %2470 = vmatpush3.msra.mxu1 %v121_v10  ;;  %v173_v9 = vld [vmem:[#allocation5 + $0x268] sm:$0xff]  ;;  %v164_v10 = vld [vmem:[#allocation5 + $0x1c0] sm:$0xff] }
 0x111   :  { %2452 = vmatprep.subr.mxu0 %v2821_v0  ;;  %2471 = vmatprep.subr.mxu1 %v2821_v0 }
 0x112   :  { %2453 = vmatpush3.msra.mxu0 %v112_v11  ;;  %2454 = vmatprep.mubr.msk.f32.mxu0 %vm2822_vm0, %v2821_v0  ;;  %v614_v15 = vpop.f32.mrf.mxu0  ;;  %v684_v16 = vpop.f32.mrf.mxu1  ;;  %v172_v11 = vld [vmem:[#allocation5 + $0x260] sm:$0xff] }
 0x113   :  { %2472 = vmatpush3.msra.mxu1 %v120_v14  ;;  %2473 = vmatprep.mubr.msk.f32.mxu1 %vm2822_vm0, %v2821_v0  ;;  %v615_v33 = vadd.f32 %v2122_v27, %v614_v15  ;;  %v685_v34 = vadd.f32 %v2123_v28, %v684_v16  ;;  %v162_v14 = vld [vmem:[#allocation5 + $0x1b0] sm:$0xff]  ;;  %v2132_v16 = vld [vmem:[#allocation8 + $0x9] ss:$0 sm:$0xff] }
 0x114   :  { %2455 = vmatmul.mubr.msk.f32.vlgmr.msra.gmra.mxu0 %vm718_vm2, %v690_v12  ;;  %2474 = vmatmul.mubr.msk.f32.vlgmr.msra.gmra.mxu1 %vm718_vm2, %v691_v13  ;;  %v2388_v19 = vpop.f32.mrf.mxu0  ;;  %v2399_v20 = vpop.f32.mrf.mxu1  ;;  %v163_v12 = vld [vmem:[#allocation5 + $0x1b8] sm:$0xff]  ;;  %v170_v15 = vld [vmem:[#allocation5 + $0x250] sm:$0xff] }
 0x115   :  { %2476 = vmatprep.subr.mxu0 %v2821_v0  ;;  %2495 = vmatprep.subr.mxu1 %v2821_v0  ;;  %v692_v38 = vmax.f32 %v615_v33, 0.0  ;;  %v693_v39 = vmax.f32 %v685_v34, 0.0  ;;  %v171_v13 = vld [vmem:[#allocation5 + $0x258] sm:$0xff]  ;;  %v169_v19 = vld [vmem:[#allocation5 + $0x248] sm:$0xff]  ;;  %v190_v33 = vld [vmem:[#allocation5 + $0x3b0] sm:$0xff] }
 0x116   :  { %2477 = vmatpush3.msra.mxu0 %v135_v17  ;;  %2496 = vmatpush3.msra.mxu1 %v143_v18  ;;  %v2133_v17 = vld [vmem:[#allocation8 + $0xd] ss:$0 sm:$0xff] }
 0x117   :  { %2478 = vmatprep.subr.mxu0 %v2821_v0  ;;  %2497 = vmatprep.subr.mxu1 %v2821_v0  ;;  %v161_v18 = vld [vmem:[#allocation5 + $0x1a8] sm:$0xff] }
 0x118   :  { %2479 = vmatpush3.msra.mxu0 %v134_v21  ;;  %2498 = vmatpush3.msra.mxu1 %v142_v22  ;;  %v160_v22 = vld [vmem:[#allocation5 + $0x1a0] sm:$0xff]  ;;  %v181_v34 = vld [vmem:[#allocation5 + $0x308] sm:$0xff] }
 0x119   :  { %2480 = vmatprep.subr.mxu0 %v2821_v0  ;;  %2499 = vmatprep.subr.mxu1 %v2821_v0 }
 0x11a   :  { %2481 = vmatpush3.msra.mxu0 %v133_v23  ;;  %2500 = vmatpush3.msra.mxu1 %v141_v24 }
 0x11b   :  { %2482 = vmatprep.subr.mxu0 %v2821_v0  ;;  %2501 = vmatprep.subr.mxu1 %v2821_v0 }
 0x11c   :  { %2483 = vmatpush3.msra.mxu0 %v132_v25  ;;  %2502 = vmatpush3.msra.mxu1 %v140_v26  ;;  %v168_v25 = vld [vmem:[#allocation5 + $0x240] sm:$0xff] }
 0x11d   :  { %2484 = vmatprep.subr.mxu0 %v2821_v0  ;;  %2503 = vmatprep.subr.mxu1 %v2821_v0 }
 0x11e   :  { %2485 = vmatpush3.msra.mxu0 %v131_v29  ;;  %2504 = vmatpush3.msra.mxu1 %v139_v30  ;;  %v183_v30 = vld [vmem:[#allocation5 + $0x318] sm:$0xff] }
 0x11f   :  { %2486 = vmatprep.subr.mxu0 %v2821_v0  ;;  %2505 = vmatprep.subr.mxu1 %v2821_v0 }
 0x120   :  { %2487 = vmatpush3.msra.mxu0 %v130_v31  ;;  %2506 = vmatpush3.msra.mxu1 %v138_v32  ;;  %v191_v31 = vld [vmem:[#allocation5 + $0x3b8] sm:$0xff]  ;;  %v182_v32 = vld [vmem:[#allocation5 + $0x310] sm:$0xff] }
 0x121   :  { %2488 = vmatprep.subr.mxu0 %v2821_v0  ;;  %2507 = vmatprep.subr.mxu1 %v2821_v0 }
 0x122   :  { %2489 = vmatpush3.msra.mxu0 %v129_v35  ;;  %2508 = vmatpush3.msra.mxu1 %v137_v36  ;;  %v189_v35 = vld [vmem:[#allocation5 + $0x3a8] sm:$0xff]  ;;  %v180_v36 = vld [vmem:[#allocation5 + $0x300] sm:$0xff] }
 0x123   :  { %2490 = vmatprep.subr.mxu0 %v2821_v0  ;;  %2509 = vmatprep.subr.mxu1 %v2821_v0 }
 0x124   :  { %2491 = vmatpush3.msra.mxu0 %v128_v37  ;;  %2492 = vmatprep.mubr.msk.f32.mxu0 %vm2822_vm0, %v2821_v0  ;;  %v188_v37 = vld [vmem:[#allocation5 + $0x3a0] sm:$0xff] }
 0x125   :  { %2510 = vmatpush3.msra.mxu1 %v136_v40  ;;  %2511 = vmatprep.mubr.msk.f32.mxu1 %vm2822_vm0, %v2821_v0  ;;  %v178_v40 = vld [vmem:[#allocation5 + $0x2f0] sm:$0xff] }
 0x126   :  { %2493 = vmatmul.mubr.msk.f32.vlgmr.msra.gmra.mxu0 %vm718_vm2, %v692_v38  ;;  %2512 = vmatmul.mubr.msk.f32.vlgmr.msra.gmra.mxu1 %vm718_vm2, %v693_v39  ;;  %v179_v38 = vld [vmem:[#allocation5 + $0x2f8] sm:$0xff] }
 0x127   :  { %2514 = vmatprep.subr.mxu0 %v2821_v0  ;;  %2533 = vmatprep.subr.mxu1 %v2821_v0  ;;  %v187_v39 = vld [vmem:[#allocation5 + $0x398] sm:$0xff] }
 0x128   :  { %2515 = vmatpush3.msra.mxu0 %v151_v41  ;;  %2534 = vmatpush3.msra.mxu1 %v159_v42  ;;  %v186_v41 = vld [vmem:[#allocation5 + $0x390] sm:$0xff] }
 0x129   :  { %2516 = vmatprep.subr.mxu0 %v2821_v0  ;;  %2535 = vmatprep.subr.mxu1 %v2821_v0  ;;  %v2134_v42 = vld [vmem:[#allocation8 + $0x11] ss:$0 sm:$0xff] }
 0x12a   :  { %2517 = vmatpush3.msra.mxu0 %v150_v43  ;;  %2536 = vmatpush3.msra.mxu1 %v158_v44  ;;  %v2135_v43 = vld [vmem:[#allocation8 + $0x15] ss:$0 sm:$0xff]  ;;  %v177_v44 = vld [vmem:[#allocation5 + $0x2e8] sm:$0xff] }
 0x12b   :  { %2518 = vmatprep.subr.mxu0 %v2821_v0  ;;  %2537 = vmatprep.subr.mxu1 %v2821_v0 }
 0x12c   :  { %2519 = vmatpush3.msra.mxu0 %v149_v45  ;;  %2538 = vmatpush3.msra.mxu1 %v157_v46  ;;  %v185_v45 = vld [vmem:[#allocation5 + $0x388] sm:$0xff] }
 0x12d   :  { %2520 = vmatprep.subr.mxu0 %v2821_v0  ;;  %2539 = vmatprep.subr.mxu1 %v2821_v0 }
 0x12e   :  { %2521 = vmatpush3.msra.mxu0 %v148_v47  ;;  %2540 = vmatpush3.msra.mxu1 %v156_v48  ;;  %v176_v48 = vld [vmem:[#allocation5 + $0x2e0] sm:$0xff] }
 0x12f   :  { %2522 = vmatprep.subr.mxu0 %v2821_v0  ;;  %2541 = vmatprep.subr.mxu1 %v2821_v0 }
 0x130   :  { %2523 = vmatpush3.msra.mxu0 %v147_v49  ;;  %2542 = vmatpush3.msra.mxu1 %v155_v50 }
 0x131   :  { %2524 = vmatprep.subr.mxu0 %v2821_v0  ;;  %2543 = vmatprep.subr.mxu1 %v2821_v0 }
 0x132   :  { %2525 = vmatpush3.msra.mxu0 %v146_v51  ;;  %2544 = vmatpush3.msra.mxu1 %v154_v52  ;;  %v184_v51 = vld [vmem:[#allocation5 + $0x380] sm:$0xff] }
 0x133   :  { %2526 = vmatprep.subr.mxu0 %v2821_v0  ;;  %2545 = vmatprep.subr.mxu1 %v2821_v0 }
 0x134   :  { %2530 = vmatprep.mubr.msk.f32.mxu0 %vm2822_vm0, %v2821_v0  ;;  %2549 = vmatprep.mubr.msk.f32.mxu1 %vm2822_vm0, %v2821_v0 }
 0x135   :  { %2527 = vmatpush3.msra.mxu0 %v145_v53  ;;  %2546 = vmatpush3.msra.mxu1 %v153_v54 }
 0x136   :  { %2528 = vmatprep.subr.mxu0 %v2821_v0  ;;  %2547 = vmatprep.subr.mxu1 %v2821_v0 }
 0x137   :  { %2529 = vmatpush3.msra.mxu0 %v144_v55  ;;  %2548 = vmatpush3.msra.mxu1 %v152_v56  ;;  %v195_v56 = vld [vmem:[#allocation7 + $0x18] sm:$0xff] }
 0x138   :  { %2552 = vmatprep.subr.mxu0 %v2821_v0  ;;  %2571 = vmatprep.subr.mxu1 %v2821_v0 }
 0x1c3   :  { %v788_v59 = vpop.f32.mrf.mxu0  ;;  %v861_v60 = vpop.f32.mrf.mxu1 }
 0x1c4   :  { %v789_v61 = vadd.f32 %v2130_v57, %v788_v59  ;;  %v862_v62 = vadd.f32 %v2131_v58, %v861_v60  ;;  %v199_v57 = vld [vmem:[#allocation7 + $0x38] sm:$0xff]  ;;  %v194_v58 = vld [vmem:[#allocation7 + $0x10] sm:$0xff]  ;;  %v193_v60 = vld [vmem:[#allocation7 + $0x8] sm:$0xff] }
 0x1c5   :  { %v2418_v63 = vpop.f32.mrf.mxu0  ;;  %v2437_v1 = vpop.f32.mrf.mxu1  ;;  %v198_v59 = vld [vmem:[#allocation7 + $0x30] sm:$0xff] }
 0x1c6   :  { %v1157_v2 = vmax.f32 %v789_v61, 0.0  ;;  %v1158_v3 = vmax.f32 %v862_v62, 0.0  ;;  %v197_v61 = vld [vmem:[#allocation7 + $0x28] sm:$0xff]  ;;  %v192_v62 = vld [vmem:[#allocation7] sm:$0xff] }
 0x1c7   :  { %v196_v63 = vld [vmem:[#allocation7 + $0x20] sm:$0xff] }
 0x1c8   :  { %2531 = vmatmul.mubr.msk.f32.vlgmr.msra.gmra.mxu0 %vm718_vm2, %v1157_v2  ;;  %2550 = vmatmul.mubr.msk.f32.vlgmr.msra.gmra.mxu1 %vm718_vm2, %v1158_v3  ;;  %v2142_v1 = vld [vmem:[#allocation8 + $0x2] ss:$0 sm:$0xff]  ;;  %v2143_v2 = vld [vmem:[#allocation8 + $0x6] ss:$0 sm:$0xff] }
 0x1c9   :  { %2553 = vmatpush3.msra.mxu0 %v167_v4  ;;  %2572 = vmatpush3.msra.mxu1 %v175_v5 }
 0x1ca   :  { %2554 = vmatprep.subr.mxu0 %v2821_v0  ;;  %2573 = vmatprep.subr.mxu1 %v2821_v0 }
 0x1cb   :  { %2555 = vmatpush3.msra.mxu0 %v166_v6  ;;  %2574 = vmatpush3.msra.mxu1 %v174_v7 }
 0x1cc   :  { %2556 = vmatprep.subr.mxu0 %v2821_v0  ;;  %2575 = vmatprep.subr.mxu1 %v2821_v0 }
 0x1cd   :  { %2557 = vmatpush3.msra.mxu0 %v165_v8  ;;  %2576 = vmatpush3.msra.mxu1 %v173_v9 }
 0x1ce   :  { %2558 = vmatprep.subr.mxu0 %v2821_v0  ;;  %2577 = vmatprep.subr.mxu1 %v2821_v0 }
 0x1cf   :  { %2559 = vmatpush3.msra.mxu0 %v164_v10  ;;  %2578 = vmatpush3.msra.mxu1 %v172_v11  ;;  %v203_v11 = vld [vmem:[#allocation7 + $0x58] sm:$0xff] }
 0x1d0   :  { %2560 = vmatprep.subr.mxu0 %v2821_v0  ;;  %2579 = vmatprep.subr.mxu1 %v2821_v0 }
 0x1d1   :  { %2561 = vmatpush3.msra.mxu0 %v163_v12  ;;  %2580 = vmatpush3.msra.mxu1 %v171_v13  ;;  %v207_v12 = vld [vmem:[#allocation7 + $0x78] sm:$0xff]  ;;  %v202_v13 = vld [vmem:[#allocation7 + $0x50] sm:$0xff] }
 0x1d2   :  { %2562 = vmatprep.subr.mxu0 %v2821_v0  ;;  %2581 = vmatprep.subr.mxu1 %v2821_v0 }
 0x1d3   :  { %2563 = vmatpush3.msra.mxu0 %v162_v14  ;;  %2582 = vmatpush3.msra.mxu1 %v170_v15  ;;  %v206_v14 = vld [vmem:[#allocation7 + $0x70] sm:$0xff]  ;;  %v201_v15 = vld [vmem:[#allocation7 + $0x48] sm:$0xff] }
 0x1d4   :  { %v934_v20 = vpop.f32.mrf.mxu0  ;;  %v1007_v21 = vpop.f32.mrf.mxu1  ;;  %2564 = vmatprep.subr.mxu0 %v2821_v0  ;;  %2583 = vmatprep.subr.mxu1 %v2821_v0 }
 0x1d5   :  { %v935_v23 = vadd.f32 %v2132_v16, %v934_v20  ;;  %v1008_v24 = vadd.f32 %v2133_v17, %v1007_v21  ;;  %2565 = vmatpush3.msra.mxu0 %v161_v18  ;;  %2584 = vmatpush3.msra.mxu1 %v169_v19  ;;  %v205_v16 = vld [vmem:[#allocation7 + $0x68] sm:$0xff]  ;;  %v200_v17 = vld [vmem:[#allocation7 + $0x40] sm:$0xff] }
 0x1d6   :  { %v2456_v26 = vpop.f32.mrf.mxu0  ;;  %v2475_v27 = vpop.f32.mrf.mxu1  ;;  %2566 = vmatprep.subr.mxu0 %v2821_v0  ;;  %2585 = vmatprep.subr.mxu1 %v2821_v0  ;;  %v204_v18 = vld [vmem:[#allocation7 + $0x60] sm:$0xff]  ;;  %v2144_v19 = vld [vmem:[#allocation8 + $0xa] ss:$0 sm:$0xff]  ;;  %v2145_v20 = vld [vmem:[#allocation8 + $0xe] ss:$0 sm:$0xff] }
 0x1d7   :  { %v1159_v28 = vmax.f32 %v935_v23, 0.0  ;;  %v1160_v29 = vmax.f32 %v1008_v24, 0.0  ;;  %2567 = vmatpush3.msra.mxu0 %v160_v22  ;;  %2568 = vmatprep.mubr.msk.f32.mxu0 %vm2822_vm0, %v2821_v0 }
 0x1d8   :  { %2586 = vmatpush3.msra.mxu1 %v168_v25  ;;  %2587 = vmatprep.mubr.msk.f32.mxu1 %vm2822_vm0, %v2821_v0 }
 0x1d9   :  { %2569 = vmatmul.mubr.msk.f32.vlgmr.msra.gmra.mxu0 %vm718_vm2, %v1159_v28  ;;  %2588 = vmatmul.mubr.msk.f32.vlgmr.msra.gmra.mxu1 %vm718_vm2, %v1160_v29  ;;  %v211_v29 = vld [vmem:[#allocation7 + $0x98] sm:$0xff] }
 0x1da   :  { %2590 = vmatprep.subr.mxu0 %v2821_v0  ;;  %2609 = vmatprep.subr.mxu1 %v2821_v0 }
 0x1db   :  { %2591 = vmatpush3.msra.mxu0 %v183_v30  ;;  %2610 = vmatpush3.msra.mxu1 %v191_v31  ;;  %v215_v30 = vld [vmem:[#allocation7 + $0xb8] sm:$0xff]  ;;  %v210_v31 = vld [vmem:[#allocation7 + $0x90] sm:$0xff] }
 0x1dc   :  { %2592 = vmatprep.subr.mxu0 %v2821_v0  ;;  %2611 = vmatprep.subr.mxu1 %v2821_v0 }
 0x1dd   :  { %2593 = vmatpush3.msra.mxu0 %v182_v32  ;;  %2612 = vmatpush3.msra.mxu1 %v190_v33  ;;  %v214_v32 = vld [vmem:[#allocation7 + $0xb0] sm:$0xff]  ;;  %v209_v33 = vld [vmem:[#allocation7 + $0x88] sm:$0xff] }
 0x1de   :  { %2594 = vmatprep.subr.mxu0 %v2821_v0  ;;  %2613 = vmatprep.subr.mxu1 %v2821_v0 }
 0x1df   :  { %2595 = vmatpush3.msra.mxu0 %v181_v34  ;;  %2614 = vmatpush3.msra.mxu1 %v189_v35  ;;  %v213_v34 = vld [vmem:[#allocation7 + $0xa8] sm:$0xff]  ;;  %v208_v35 = vld [vmem:[#allocation7 + $0x80] sm:$0xff] }
 0x1e0   :  { %2596 = vmatprep.subr.mxu0 %v2821_v0  ;;  %2615 = vmatprep.subr.mxu1 %v2821_v0 }
 0x1e1   :  { %2597 = vmatpush3.msra.mxu0 %v180_v36  ;;  %2616 = vmatpush3.msra.mxu1 %v188_v37  ;;  %v212_v36 = vld [vmem:[#allocation7 + $0xa0] sm:$0xff]  ;;  %v2146_v37 = vld [vmem:[#allocation8 + $0x12] ss:$0 sm:$0xff] }
 0x1e2   :  { %2598 = vmatprep.subr.mxu0 %v2821_v0  ;;  %2617 = vmatprep.subr.mxu1 %v2821_v0 }
 0x1e3   :  { %2599 = vmatpush3.msra.mxu0 %v179_v38  ;;  %2618 = vmatpush3.msra.mxu1 %v187_v39  ;;  %v2147_v38 = vld [vmem:[#allocation8 + $0x16] ss:$0 sm:$0xff] }
 0x1e4   :  { %2600 = vmatprep.subr.mxu0 %v2821_v0  ;;  %2619 = vmatprep.subr.mxu1 %v2821_v0 }
 0x1e5   :  { %2601 = vmatpush3.msra.mxu0 %v178_v40  ;;  %2620 = vmatpush3.msra.mxu1 %v186_v41 }
 0x1e6   :  { %v1080_v46 = vpop.f32.mrf.mxu0  ;;  %v1153_v47 = vpop.f32.mrf.mxu1  ;;  %2602 = vmatprep.subr.mxu0 %v2821_v0  ;;  %2621 = vmatprep.subr.mxu1 %v2821_v0 }
 0x1e7   :  { %v1081_v49 = vadd.f32 %v2134_v42, %v1080_v46  ;;  %v1154_v50 = vadd.f32 %v2135_v43, %v1153_v47  ;;  %2603 = vmatpush3.msra.mxu0 %v177_v44  ;;  %2622 = vmatpush3.msra.mxu1 %v185_v45  ;;  %v2154_v47 = vld [vmem:[#allocation8 + $0x3] ss:$0 sm:$0xff] }
 0x1e8   :  { %v2494_v52 = vpop.f32.mrf.mxu0  ;;  %v2513_v53 = vpop.f32.mrf.mxu1  ;;  %2604 = vmatprep.subr.mxu0 %v2821_v0  ;;  %2623 = vmatprep.subr.mxu1 %v2821_v0 }
 0x1e9   :  { %v1161_v54 = vmax.f32 %v1081_v49, 0.0  ;;  %v1162_v55 = vmax.f32 %v1154_v50, 0.0  ;;  %2605 = vmatpush3.msra.mxu0 %v176_v48  ;;  %2606 = vmatprep.mubr.msk.f32.mxu0 %vm2822_vm0, %v2821_v0  ;;  %v2155_v48 = vld [vmem:[#allocation8 + $0x7] ss:$0 sm:$0xff] }
 0x1ea   :  { %2624 = vmatpush3.msra.mxu1 %v184_v51  ;;  %2625 = vmatprep.mubr.msk.f32.mxu1 %vm2822_vm0, %v2821_v0 }
 0x1eb   :  { %2607 = vmatmul.mubr.msk.f32.vlgmr.msra.gmra.mxu0 %vm718_vm2, %v1161_v54  ;;  %2626 = vmatmul.mubr.msk.f32.vlgmr.msra.gmra.mxu1 %vm718_vm2, %v1162_v55  ;;  %v2156_v54 = vld [vmem:[#allocation8 + $0xb] ss:$0 sm:$0xff]  ;;  %v2157_v55 = vld [vmem:[#allocation8 + $0xf] ss:$0 sm:$0xff] }
 0x1ec   :  { %2628 = vmatprep.subr.mxu0 %v2821_v0  ;;  %2639 = vmatprep.subr.mxu1 %v2821_v0 }
 0x1ed   :  { %2629 = vmatpush3.msra.mxu0 %v195_v56  ;;  %2640 = vmatpush3.msra.mxu1 %v199_v57 }
 0x1ee   :  { %2630 = vmatprep.subr.mxu0 %v2821_v0  ;;  %2641 = vmatprep.subr.mxu1 %v2821_v0 }
 0x1ef   :  { %2636 = vmatprep.mubr.msk.f32.mxu0 %vm2822_vm0, %v2821_v0  ;;  %2647 = vmatprep.mubr.msk.f32.mxu1 %vm2822_vm0, %v2821_v0 }
 0x1f0   :  { %2631 = vmatpush3.msra.mxu0 %v194_v58  ;;  %2642 = vmatpush3.msra.mxu1 %v198_v59 }
 0x1f1   :  { %2632 = vmatprep.subr.mxu0 %v2821_v0  ;;  %2643 = vmatprep.subr.mxu1 %v2821_v0 }
 0x1f2   :  { %2633 = vmatpush3.msra.mxu0 %v193_v60  ;;  %2644 = vmatpush3.msra.mxu1 %v197_v61 }
 0x1f3   :  { %2634 = vmatprep.subr.mxu0 %v2821_v0  ;;  %2645 = vmatprep.subr.mxu1 %v2821_v0 }
 0x1f4   :  { %2635 = vmatpush3.msra.mxu0 %v192_v62  ;;  %2646 = vmatpush3.msra.mxu1 %v196_v63  ;;  %v2158_v62 = vld [vmem:[#allocation8 + $0x13] ss:$0 sm:$0xff]  ;;  %v2159_v63 = vld [vmem:[#allocation8 + $0x17] ss:$0 sm:$0xff] }
 0x1f5   :  { %2650 = vmatprep.subr.mxu0 %v2821_v0  ;;  %2661 = vmatprep.subr.mxu1 %v2821_v0 }
 0x288   :  { %v1256_v3 = vpop.f32.mrf.mxu0  ;;  %v1329_v4 = vpop.f32.mrf.mxu1 }
 0x289   :  { %v1257_v5 = vadd.f32 %v2142_v1, %v1256_v3  ;;  %v1330_v6 = vadd.f32 %v2143_v2, %v1329_v4 }
 0x28a   :  { %v2532_v7 = vpop.f32.mrf.mxu0  ;;  %v2551_v8 = vpop.f32.mrf.mxu1 }
 0x28b   :  { %v1625_v9 = vmax.f32 %v1257_v5, 0.0  ;;  %v1626_v10 = vmax.f32 %v1330_v6, 0.0 }
 0x28d   :  { %2637 = vmatmul.mubr.msk.f32.vlgmr.msra.gmra.mxu0 %vm264_vm1, %v1625_v9  ;;  %2648 = vmatmul.mubr.msk.f32.vlgmr.msra.gmra.mxu1 %vm264_vm1, %v1626_v10 }
 0x28e   :  { %2651 = vmatpush3.msra.mxu0 %v203_v11  ;;  %2662 = vmatpush3.msra.mxu1 %v207_v12 }
 0x28f   :  { %2652 = vmatprep.subr.mxu0 %v2821_v0  ;;  %2663 = vmatprep.subr.mxu1 %v2821_v0 }
 0x290   :  { %2653 = vmatpush3.msra.mxu0 %v202_v13  ;;  %2664 = vmatpush3.msra.mxu1 %v206_v14 }
 0x291   :  { %2654 = vmatprep.subr.mxu0 %v2821_v0  ;;  %2665 = vmatprep.subr.mxu1 %v2821_v0 }
 0x292   :  { %2655 = vmatpush3.msra.mxu0 %v201_v15  ;;  %2666 = vmatpush3.msra.mxu1 %v205_v16 }
 0x293   :  { %2656 = vmatprep.subr.mxu0 %v2821_v0  ;;  %2667 = vmatprep.subr.mxu1 %v2821_v0 }
 0x294   :  { %2657 = vmatpush3.msra.mxu0 %v200_v17  ;;  %2658 = vmatprep.mubr.msk.f32.mxu0 %vm2822_vm0, %v2821_v0 }
 0x295   :  { %2668 = vmatpush3.msra.mxu1 %v204_v18  ;;  %2669 = vmatprep.mubr.msk.f32.mxu1 %vm2822_vm0, %v2821_v0 }
 0x296   :  { %2672 = vmatprep.subr.mxu0 %v2821_v0  ;;  %2683 = vmatprep.subr.mxu1 %v2821_v0 }
 0x299   :  { %v1402_v21 = vpop.f32.mrf.mxu0  ;;  %v1475_v22 = vpop.f32.mrf.mxu1 }
 0x29a   :  { %v1403_v23 = vadd.f32 %v2144_v19, %v1402_v21  ;;  %v1476_v24 = vadd.f32 %v2145_v20, %v1475_v22 }
 0x29b   :  { %v2570_v25 = vpop.f32.mrf.mxu0  ;;  %v2589_v26 = vpop.f32.mrf.mxu1 }
 0x29c   :  { %v1627_v27 = vmax.f32 %v1403_v23, 0.0  ;;  %v1628_v28 = vmax.f32 %v1476_v24, 0.0 }
 0x29e   :  { %2659 = vmatmul.mubr.msk.f32.vlgmr.msra.gmra.mxu0 %vm264_vm1, %v1627_v27  ;;  %2670 = vmatmul.mubr.msk.f32.vlgmr.msra.gmra.mxu1 %vm264_vm1, %v1628_v28 }
 0x29f   :  { %2673 = vmatpush3.msra.mxu0 %v211_v29  ;;  %2684 = vmatpush3.msra.mxu1 %v215_v30 }
 0x2a0   :  { %2674 = vmatprep.subr.mxu0 %v2821_v0  ;;  %2685 = vmatprep.subr.mxu1 %v2821_v0 }
 0x2a1   :  { %2675 = vmatpush3.msra.mxu0 %v210_v31  ;;  %2686 = vmatpush3.msra.mxu1 %v214_v32 }
 0x2a2   :  { %2676 = vmatprep.subr.mxu0 %v2821_v0  ;;  %2687 = vmatprep.subr.mxu1 %v2821_v0 }
 0x2a3   :  { %2677 = vmatpush3.msra.mxu0 %v209_v33  ;;  %2688 = vmatpush3.msra.mxu1 %v213_v34 }
 0x2a4   :  { %2678 = vmatprep.subr.mxu0 %v2821_v0  ;;  %2689 = vmatprep.subr.mxu1 %v2821_v0 }
 0x2a5   :  { %2679 = vmatpush3.msra.mxu0 %v208_v35  ;;  %2680 = vmatprep.mubr.msk.f32.mxu0 %vm2822_vm0, %v2821_v0 }
 0x2a6   :  { %2690 = vmatpush3.msra.mxu1 %v212_v36  ;;  %2691 = vmatprep.mubr.msk.f32.mxu1 %vm2822_vm0, %v2821_v0 }
 0x2ab   :  { %v1548_v39 = vpop.f32.mrf.mxu0  ;;  %v1621_v40 = vpop.f32.mrf.mxu1 }
 0x2ac   :  { %v1549_v41 = vadd.f32 %v2146_v37, %v1548_v39  ;;  %v1622_v42 = vadd.f32 %v2147_v38, %v1621_v40 }
 0x2ad   :  { %v2608_v43 = vpop.f32.mrf.mxu0  ;;  %v2627_v44 = vpop.f32.mrf.mxu1 }
 0x2ae   :  { %v1629_v45 = vmax.f32 %v1549_v41, 0.0  ;;  %v1630_v46 = vmax.f32 %v1622_v42, 0.0 }
 0x2b0   :  { %2681 = vmatmul.mubr.msk.f32.vlgmr.msra.gmra.mxu0 %vm264_vm1, %v1629_v45  ;;  %2692 = vmatmul.mubr.msk.f32.vlgmr.msra.gmra.mxu1 %vm264_vm1, %v1630_v46 }
 0x34d   :  { %v1724_v49 = vpop.f32.mrf.mxu0  ;;  %v1797_v50 = vpop.f32.mrf.mxu1 }
 0x34e   :  { %v1725_v51 = vadd.f32 %v2154_v47, %v1724_v49  ;;  %v1798_v0 = vadd.f32 %v2155_v48, %v1797_v50 }
 0x34f   :  { %v2638_v52 = vpop.f32.mrf.mxu0  ;;  %v2649_v53 = vpop.f32.mrf.mxu1 }
 0x350   :  { %2093 = vst [vmem:[#allocation10] sm:$0xff] %v1725_v51  ;;  %2094 = vst [vmem:[#allocation10 + $0x8] sm:$0xff] %v1798_v0 }
 0x35e   :  { %v1870_v56 = vpop.f32.mrf.mxu0  ;;  %v1943_v57 = vpop.f32.mrf.mxu1 }
 0x35f   :  { %v1871_v58 = vadd.f32 %v2156_v54, %v1870_v56  ;;  %v1944_v59 = vadd.f32 %v2157_v55, %v1943_v57 }
 0x360   :  { %v2660_v60 = vpop.f32.mrf.mxu0  ;;  %v2671_v61 = vpop.f32.mrf.mxu1 }
 0x361   :  { %2095 = vst [vmem:[#allocation10 + $0x10] sm:$0xff] %v1871_v58  ;;  %2096 = vst [vmem:[#allocation10 + $0x18] sm:$0xff] %v1944_v59 }
 0x370   :  { %v2016_v1 = vpop.f32.mrf.mxu0  ;;  %v2089_v2 = vpop.f32.mrf.mxu1 }
 0x371   :  { %v2017_v3 = vadd.f32 %v2158_v62, %v2016_v1  ;;  %v2090_v4 = vadd.f32 %v2159_v63, %v2089_v2 }
 0x372   :  { %v2682_v5 = vpop.f32.mrf.mxu0  ;;  %v2693_v6 = vpop.f32.mrf.mxu1 }
 0x373   :  { %2097 = vst [vmem:[#allocation10 + $0x20] sm:$0xff] %v2017_v3  ;;  %2098 = vst [vmem:[#allocation10 + $0x28] sm:$0xff] %v2090_v4 }
 0x374   :  { %2796 = shalt.err (!%p2793_p10)
}
 0x375   :  { %2110 = dma.vmem_to_hbm [thread:$0]  %s2105_s3, 768, %s3101_s4, [#allocation4], %s2814_s18, %s2814_s18, %s2815_s19  }
 0x376   :  { %2811 = dma.done.wait [#allocation4], 768  }
 0x377   :  { %2812 = vsyncadd [#allocation4], 4294966528 }
 0x378   :  { %2114 = vsyncpa [#allocation3], 1 }
 0x379   :  { %2115 = vsyncpa [#allocation6], 1 }
 0x37a   :  { %2116 = vsyncpa [#allocation9], 1 }
 0x37b   :  { %2117 = vsyncpa [#allocation4], 1 }

</bundles_post_ra>
